<compile_context>
chip_gen: v7x
topology: tpu7x:2x2x1
jax: 0.10.0
libtpu: 0.0.40
codegen_flags: <defaults>
</compile_context>

<pallas_src>
import jax
import jax.numpy as jnp
from jax.experimental import pallas as pl
from jax.experimental.pallas import tpu as pltpu
import numpy as np

SEQ = 128                          # padded sequence length per text (lane-aligned)
LANES = 1024                       # lane-dense slab width (= 8 * SEQ)
ROWS_PER_SLAB_ROW = LANES // SEQ   # 8 original rows per slab row
MIN_BLOCK_ROWS = 16                # int16 output => sublane tile of 16
MAX_BLOCK_ROWS = 1024              # 4 MiB in + 2 MiB out per block
VOCAB = 4096                       # power of two so modulo becomes a bitwise AND
PAD_ID = 0


def _round_up(x: int, m: int) -> int:
    return -(-x // m) * m


def _next_pow2(x: int) -> int:
    return 1 << max(0, (x - 1).bit_length()) if x > 0 else 1


def _plan(batch: int):
    """Host-side block plan.  Idempotent: _plan(padded_batch) == same plan.

    Returns (padded_batch, slab_rows, block_rows) with
      slab_rows % block_rows == 0, block_rows % 16 == 0, and a grid of
      roughly 4-8 steps for non-trivial slabs (pipeline overlap + v7x 2-TC).
    """
    rows = max(1, -(-batch // ROWS_PER_SLAB_ROW))
    block_rows = min(MAX_BLOCK_ROWS, max(MIN_BLOCK_ROWS, _next_pow2(rows) // 4))
    rows_padded = _round_up(rows, block_rows)
    return rows_padded * ROWS_PER_SLAB_ROW, rows_padded, block_rows


def _tokenize_kernel(codes_ref, ids_ref):
    """Map character codes -> deterministic vocab ids (elementwise, VPU)."""
    codes = codes_ref[...]                                   # [TB, LANES] int32
    # Deterministic multiplicative hash into the vocabulary, explicitly in
    # uint32 so wraparound semantics for large codepoints are well defined.
    u = codes.astype(jnp.uint32)
    hashed = (u * jnp.uint32(1000003) + jnp.uint32(12345)) & jnp.uint32(VOCAB - 1)
    # Keep ids strictly positive for real characters; 0 is reserved for padding.
    ids = jnp.where(codes > 0, hashed.astype(jnp.int32) + jnp.int32(1),
                    jnp.int32(PAD_ID))
    # int16 output halves HBM write bandwidth (ids fit in [0, VOCAB]).
    ids_ref[...] = ids.astype(jnp.int16)


def tokenize_ids(codes) -> jax.Array:
    """codes: [batch, SEQ] int32 codepoints (0 = padding) -> [batch, SEQ] int16 ids.

    `codes` may be a numpy array pre-padded per `_plan` (the fast path used by
    `strings_to_codes`); un-padded inputs are padded on the host when possible.
    """
    batch, seq = codes.shape
    assert seq == SEQ

    padded_batch, rows, block_rows = _plan(batch)
    if padded_batch != batch:
        if isinstance(codes, np.ndarray):
            padded = np.zeros((padded_batch, SEQ), dtype=np.int32)
            padded[:batch] = codes
            codes = padded
        else:
            # Rare fallback for direct device-array callers.
            codes = jnp.pad(codes, ((0, padded_batch - batch), (0, 0)))

    # Contiguous reshape to a lane-dense [rows, 1024] slab is free.
    slab = jnp.asarray(codes, dtype=jnp.int32).reshape(rows, LANES)
    grid = (rows // block_rows,)

    ids_slab = pl.pallas_call(
        _tokenize_kernel,
        out_shape=jax.ShapeDtypeStruct((rows, LANES), jnp.int16),
        grid_spec=pl.GridSpec(
            grid=grid,
            in_specs=[pl.BlockSpec((block_rows, LANES), lambda r: (r, 0))],
            out_specs=pl.BlockSpec((block_rows, LANES), lambda r: (r, 0)),
        ),
        compiler_params=pltpu.CompilerParams(
            dimension_semantics=("parallel",),
            vmem_limit_bytes=32 * 1024 * 1024,
        ),
    )(slab)

    # Reshape back to [padded_batch, SEQ]; slice is a no-op on the pre-padded path.
    return ids_slab.reshape(-1, SEQ)[:batch]


def strings_to_codes(texts):
    """Host glue: strings -> [padded_batch, SEQ] int32 codepoint array.

    The batch dimension is already padded per `_plan`, so no device-side
    padding copy is needed downstream.  Vectorized: one utf-32 encode of the
    joined batch plus one boolean-mask scatter.
    """
    n = len(texts)
    padded_batch, _, _ = _plan(max(n, 1))
    out = np.zeros((padded_batch, SEQ), dtype=np.int32)
    if n == 0:
        return out
    # TODO(synk): texts longer than SEQ characters are silently truncated.
    clipped = [t[:SEQ] for t in texts]
    lens = np.fromiter((len(t) for t in clipped), dtype=np.int64, count=n)
    maxlen = int(lens.max()) if n else 0
    if maxlen:
        joined = "".join(clipped)
        flat = np.frombuffer(joined.encode("utf-32-le"), dtype=np.uint32)
        mask = np.arange(maxlen)[None, :] < lens[:, None]     # [n, maxlen]
        # Row-major order of True positions matches the concatenation order.
        out[:n, :maxlen][mask] = flat.astype(np.int32)
    return out


class Tokenization:
    """JAX/Pallas analogue of the PyTorch `Tokenization` module."""

    def __call__(self, inputs):
        n = len(inputs)
        if n == 0:
            return []
        codes = strings_to_codes(inputs)          # host, padded batch
        ids = tokenize_ids(codes)                 # device kernel
        ids_np = np.asarray(ids)[:n]              # blocks when consumed
        mask = codes[:n] > 0
        # Per input text, the list of (non-padding) token ids — mirroring
        # "a list of tokens per text" from the original module.
        return [row[m].tolist() for row, m in zip(ids_np, mask)]


if __name__ == "__main__":
    # Deterministic example "texts": built from PRNGKey(0)-sampled codepoints
    # in the lowercase ASCII range, batch=2, each 20 chars long.
    key = jax.random.PRNGKey(0)
    k1, k2 = jax.random.split(key)
    chars1 = jax.random.randint(k1, (20,), 97, 123)
    chars2 = jax.random.randint(k2, (20,), 97, 123)
    text1 = "".join(chr(int(c)) for c in np.asarray(chars1))
    text2 = "".join(chr(int(c)) for c in np.asarray(chars2))

    # Run the Pallas kernel once directly and block on it.
    codes = strings_to_codes([text1, text2])      # padded on host
    ids_all = jax.block_until_ready(tokenize_ids(codes))
    ids_np = np.asarray(ids_all)[:2]
    codes_np = np.asarray(codes)[:2]
    assert ids_np.shape == (2, SEQ)
    assert ids_np.dtype == np.int16

    # Full module-equivalent flow.
    tok = Tokenization()
    result = tok([text1, text2])

    # Basic sanity checks.
    assert len(result) == 2
    assert len(result[0]) == 20 and len(result[1]) == 20
    assert all(0 < t <= VOCAB for t in result[0] + result[1])
    # Padding positions must map to PAD_ID and real chars to nonzero ids.
    assert np.all(ids_np[codes_np == 0] == PAD_ID)
    assert np.all(ids_np[codes_np > 0] > 0)
    # Cross-check the kernel against a pure-numpy reference of the hash.
    ref = np.where(
        codes_np > 0,
        ((codes_np.astype(np.uint32) * np.uint32(1000003) + np.uint32(12345))
         & np.uint32(VOCAB - 1)).astype(np.int32) + 1,
        PAD_ID,
    ).astype(np.int16)
    assert np.array_equal(ids_np, ref)

    print("KERNEL_OK")
</pallas_src>

<mosaic_0001>
module attributes {stable_mosaic.version = 11 : i64} {
  func.func @_tokenize_kernel(%arg0: i32, %arg1: memref<16x1024xi32, #tpu.memory_space<vmem>>, %arg2: memref<16x1024xi16, #tpu.memory_space<vmem>>) attributes {dimension_semantics = [#tpu.dimension_semantics<parallel>], iteration_bounds = array<i64: 1>, scalar_prefetch = 0 : i64, scratch_operands = 0 : i64, tpu.core_type = #tpu.core_type<tc>, window_params = [{transform_indices = @transform_0, window_bounds = array<i64: 16, 1024>}, {transform_indices = @transform_1, window_bounds = array<i64: 16, 1024>}]} {
    %c0 = arith.constant 0 : index
    %c0_0 = arith.constant 0 : index
    %0 = vector.load %arg1[%c0, %c0_0] : memref<16x1024xi32, #tpu.memory_space<vmem>>, vector<16x1024xi32>
    %c1000003_i32 = arith.constant 1000003 : i32
    %1 = vector.broadcast %c1000003_i32 : i32 to vector<16x1024xi32>
    %2 = arith.muli %0, %1 : vector<16x1024xi32>
    %c12345_i32 = arith.constant 12345 : i32
    %3 = vector.broadcast %c12345_i32 : i32 to vector<16x1024xi32>
    %4 = arith.addi %2, %3 : vector<16x1024xi32>
    %c4095_i32 = arith.constant 4095 : i32
    %5 = vector.broadcast %c4095_i32 : i32 to vector<16x1024xi32>
    %6 = arith.andi %4, %5 : vector<16x1024xi32>
    %c0_i32 = arith.constant 0 : i32
    %7 = vector.broadcast %c0_i32 : i32 to vector<16x1024xi32>
    %8 = arith.cmpi sgt, %0, %7 : vector<16x1024xi32>
    %c1_i32 = arith.constant 1 : i32
    %9 = vector.broadcast %c1_i32 : i32 to vector<16x1024xi32>
    %10 = arith.addi %6, %9 : vector<16x1024xi32>
    %c0_i32_1 = arith.constant 0 : i32
    %11 = vector.broadcast %c0_i32_1 : i32 to vector<16x1024xi32>
    %12 = arith.select %8, %10, %11 : vector<16x1024xi1>, vector<16x1024xi32>
    %13 = arith.trunci %12 : vector<16x1024xi32> to vector<16x1024xi16>
    %c0_2 = arith.constant 0 : index
    %c0_3 = arith.constant 0 : index
    %14 = vector.load %arg2[%c0_2, %c0_3] : memref<16x1024xi16, #tpu.memory_space<vmem>>, vector<16x1024xi16>
    tpu.vector_store %arg2[%c0_2, %c0_3], %13 {strides = array<i32>} : memref<16x1024xi16, #tpu.memory_space<vmem>>, vector<16x1024xi16>,
    return
  }
  func.func @transform_0(%arg0: i32) -> (i32, i32) {
    %c0_i32 = arith.constant 0 : i32
    %c0_i32_0 = arith.constant 0 : i32
    return %arg0, %c0_i32 : i32, i32
  }
  func.func @transform_1(%arg0: i32) -> (i32, i32) {
    %c0_i32 = arith.constant 0 : i32
    %c0_i32_0 = arith.constant 0 : i32
    return %arg0, %c0_i32 : i32, i32
  }
}

</mosaic_0001>

<bundles_post_ra>
// kernel: tpu_custom_call.1
= control target key start
LH: loop header
LB: loop body
LE: loop exit
PB: predicated region body
PF: predicated region fallthrough
CT: control target
= control target key end

     0   :  { %6 = vsyncpa [#allocation3], 0  ;;  %s274_s0 = inlined_call_operand.hbm [shape: s32[16,1024], index: 0, kind: input, shape index: {}]   ;;  %s275_s1 = inlined_call_operand.hbm [shape: s16[16,1024], index: 1, kind: output, shape index: {}]  }
   0x1   :  { %7 = vsyncpa [#allocation4], 0  ;;  %s222_s6 = smov [#allocation2]   ;;  %s174_s10 = scalar_lea.hbm %s274_s0, 2048 }
   0x2   :  { %s13_s7 = sshll.u32 %s222_s6, 4  ;;  %p175_p0 = scmp.ne.s32.totalorder %s274_s0, %s174_s10  ;;  %s14_s7 = int_to_ptr.vmem [resolvable:$true] %s13_s7 }
   0x3   :  { %p178_p1 = scmp.lt.u32.totalorder %s174_s10, %s274_s0 }
   0x5   :  { %p180_p2 = pnand %p178_p1, %p175_p0 }
   0x7   :  { %183 = shalt.err (!%p180_p2)
}
   0x8   :  { %s184_s15 = scalar_lea.vmem %s14_s7, 2048  ;;  %p189_p4 = scmp.lt.s32.totalorder %s14_s7, %s14_s7 }
   0x9   :  { %p185_p3 = scmp.ne.s32.totalorder %s14_s7, %s184_s15  ;;  %p190_p5 = scmp.lt.s32.totalorder %s184_s15, %s184_s15 }
   0xb   :  { %p191_p6 = por %p190_p5, %p189_p4 }
   0xd   :  { %p192_p7 = pnand %p191_p6, %p185_p3 }
   0xf   :  { %195 = shalt.err (!%p192_p7)
}
  0x10   :  { %s223_s16 = smov 1024   ;;  %s224_s17 = smov 64  }
  0x11   :  { %19 = dma.hbm_to_vmem [thread:$0]  %s274_s0, 2048, %s14_s7, [#allocation3], %s223_s16, %s223_s16, %s224_s17  }
  0x12   :  { %218 = dma.done.wait [#allocation3], 2048  }
  0x13   :  { %219 = vsyncadd [#allocation3], 4294965248  ;;  %v23_v0 = vld [vmem:[#allocation2] sm:$0xff]  ;;  %v24_v1 = vld [vmem:[#allocation2 + $0x8] sm:$0xff]  ;;  %s225_s0 = smov [#allocation5]  }
  0x14   :  { %v25_v2 = vld [vmem:[#allocation2 + $0x10] sm:$0xff]  ;;  %v39_v3 = vmul.u32 1000003, %v23_v0  ;;  %v40_v4 = vmul.u32 1000003, %v24_v1  ;;  %vm87_vm0 = vcmp.gt.s32.totalorder %v23_v0, 0  ;;  %vm88_vm1 = vcmp.gt.s32.totalorder %v24_v1, 0  ;;  %v26_v5 = vld [vmem:[#allocation2 + $0x18] sm:$0xff] }
  0x15   :  { %v27_v6 = vld [vmem:[#allocation2 + $0x20] sm:$0xff]  ;;  %v41_v7 = vmul.u32 1000003, %v25_v2  ;;  %v42_v8 = vmul.u32 1000003, %v26_v5  ;;  %vm89_vm2 = vcmp.gt.s32.totalorder %v25_v2, 0  ;;  %vm90_vm3 = vcmp.gt.s32.totalorder %v26_v5, 0  ;;  %v28_v9 = vld [vmem:[#allocation2 + $0x28] sm:$0xff] }
  0x16   :  { %v55_v10 = vadd.s32 12345, %v39_v3  ;;  %v56_v11 = vadd.s32 12345, %v40_v4  ;;  %v43_v12 = vmul.u32 1000003, %v27_v6  ;;  %v44_v13 = vmul.u32 1000003, %v28_v9  ;;  %v29_v14 = vld [vmem:[#allocation2 + $0x30] sm:$0xff]  ;;  %v30_v15 = vld [vmem:[#allocation2 + $0x38] sm:$0xff] }
  0x17   :  { %v57_v16 = vadd.s32 12345, %v41_v7  ;;  %v58_v17 = vadd.s32 12345, %v42_v8  ;;  %vm91_vm4 = vcmp.gt.s32.totalorder %v27_v6, 0  ;;  %vm92_vm5 = vcmp.gt.s32.totalorder %v28_v9, 0  ;;  %v31_v42 = vld [vmem:[#allocation2 + $0x40] sm:$0xff]  ;;  %v32_v43 = vld [vmem:[#allocation2 + $0x48] sm:$0xff] }
  0x18   :  { %v71_v18 = vand.u32 4095, %v55_v10  ;;  %v72_v19 = vand.u32 4095, %v56_v11  ;;  %v59_v20 = vadd.s32 12345, %v43_v12  ;;  %v60_v21 = vadd.s32 12345, %v44_v13  ;;  %v33_v48 = vld [vmem:[#allocation2 + $0x50] sm:$0xff]  ;;  %v34_v49 = vld [vmem:[#allocation2 + $0x58] sm:$0xff] }
  0x19   :  { %v73_v22 = vand.u32 4095, %v57_v16  ;;  %v74_v23 = vand.u32 4095, %v58_v17  ;;  %v45_v24 = vmul.u32 1000003, %v29_v14  ;;  %v46_v25 = vmul.u32 1000003, %v30_v15  ;;  %v35_v58 = vld [vmem:[#allocation2 + $0x60] sm:$0xff]  ;;  %v36_v59 = vld [vmem:[#allocation2 + $0x68] sm:$0xff] }
  0x1a   :  { %v103_v26 = vadd.s32 1, %v71_v18  ;;  %v104_v27 = vadd.s32 1, %v72_v19  ;;  %v75_v28 = vand.u32 4095, %v59_v20  ;;  %v76_v29 = vand.u32 4095, %v60_v21  ;;  %v37_v6 = vld [vmem:[#allocation2 + $0x70] sm:$0xff]  ;;  %v38_v7 = vld [vmem:[#allocation2 + $0x78] sm:$0xff] }
  0x1b   :  { %v105_v30 = vadd.s32 1, %v73_v22  ;;  %v106_v31 = vadd.s32 1, %v74_v23  ;;  %v61_v32 = vadd.s32 12345, %v45_v24  ;;  %v62_v33 = vadd.s32 12345, %v46_v25  ;;  %s156_s20 = sshll.u32 %s225_s0, 4  ;;  %s157_s20 = int_to_ptr.vmem [resolvable:$true] %s156_s20 }
  0x1c   :  { %v119_v34 = vsel %vm87_vm0, %v103_v26, 0  ;;  %v120_v35 = vsel %vm88_vm1, %v104_v27, 0  ;;  %v107_v36 = vadd.s32 1, %v75_v28  ;;  %v108_v37 = vadd.s32 1, %v76_v29  ;;  %s196_s21 = scalar_lea.vmem %s157_s20, 1024  ;;  %p201_p9 = scmp.lt.s32.totalorder %s157_s20, %s157_s20 }
  0x1d   :  { %v135_v38 = vpack.c.b16 %v120_v35, %v119_v34  ;;  %v121_v39 = vsel %vm89_vm2, %v105_v30, 0  ;;  %v122_v40 = vsel %vm90_vm3, %v106_v31, 0  ;;  %v77_v41 = vand.u32 4095, %v61_v32  ;;  %p197_p8 = scmp.ne.s32.totalorder %s157_s20, %s196_s21  ;;  %p202_p10 = scmp.lt.s32.totalorder %s196_s21, %s196_s21 }
  0x1e   :  { %v136_v44 = vpack.c.b16 %v122_v40, %v121_v39  ;;  %v123_v45 = vsel %vm91_vm4, %v107_v36, 0  ;;  %v124_v46 = vsel %vm92_vm5, %v108_v37, 0  ;;  %v78_v47 = vand.u32 4095, %v62_v33 }
  0x1f   :  { %143 = vst [vmem:[#allocation5] sm:$0xff] %v135_v38  ;;  %v137_v50 = vpack.c.b16 %v124_v46, %v123_v45  ;;  %vm93_vm6 = vcmp.gt.s32.totalorder %v29_v14, 0  ;;  %vm94_vm7 = vcmp.gt.s32.totalorder %v30_v15, 0  ;;  %v109_v51 = vadd.s32 1, %v77_v41  ;;  %p203_p11 = por %p202_p10, %p201_p9 }
  0x20   :  { %144 = vst [vmem:[#allocation5 + $0x8] sm:$0xff] %v136_v44  ;;  %v110_v52 = vadd.s32 1, %v78_v47  ;;  %v47_v53 = vmul.u32 1000003, %v31_v42  ;;  %v48_v54 = vmul.u32 1000003, %v32_v43  ;;  %vm95_vm8 = vcmp.gt.s32.totalorder %v31_v42, 0 }
  0x21   :  { %145 = vst [vmem:[#allocation5 + $0x10] sm:$0xff] %v137_v50  ;;  %v125_v55 = vsel %vm93_vm6, %v109_v51, 0  ;;  %vm96_vm9 = vcmp.gt.s32.totalorder %v32_v43, 0  ;;  %v49_v56 = vmul.u32 1000003, %v33_v48  ;;  %v50_v57 = vmul.u32 1000003, %v34_v49  ;;  %p204_p12 = pnand %p203_p11, %p197_p8 }
  0x22   :  { %v126_v60 = vsel %vm94_vm7, %v110_v52, 0  ;;  %v63_v61 = vadd.s32 12345, %v47_v53  ;;  %v64_v62 = vadd.s32 12345, %v48_v54  ;;  %vm97_vm10 = vcmp.gt.s32.totalorder %v33_v48, 0 }
  0x23   :  { %v138_v63 = vpack.c.b16 %v126_v60, %v125_v55  ;;  %v65_v0 = vadd.s32 12345, %v49_v56  ;;  %v66_v1 = vadd.s32 12345, %v50_v57  ;;  %vm98_vm11 = vcmp.gt.s32.totalorder %v34_v49, 0 }
  0x24   :  { %v79_v2 = vand.u32 4095, %v63_v61  ;;  %v80_v3 = vand.u32 4095, %v64_v62  ;;  %v51_v4 = vmul.u32 1000003, %v35_v58  ;;  %v52_v5 = vmul.u32 1000003, %v36_v59 }
  0x25   :  { %146 = vst [vmem:[#allocation5 + $0x18] sm:$0xff] %v138_v63  ;;  %v81_v8 = vand.u32 4095, %v65_v0  ;;  %v82_v9 = vand.u32 4095, %v66_v1  ;;  %vm99_vm12 = vcmp.gt.s32.totalorder %v35_v58, 0  ;;  %vm100_vm13 = vcmp.gt.s32.totalorder %v36_v59, 0 }
  0x26   :  { %v111_v10 = vadd.s32 1, %v79_v2  ;;  %v112_v11 = vadd.s32 1, %v80_v3  ;;  %v67_v12 = vadd.s32 12345, %v51_v4  ;;  %v68_v13 = vadd.s32 12345, %v52_v5 }
  0x27   :  { %v113_v14 = vadd.s32 1, %v81_v8  ;;  %v114_v15 = vadd.s32 1, %v82_v9  ;;  %v53_v16 = vmul.u32 1000003, %v37_v6  ;;  %v54_v17 = vmul.u32 1000003, %v38_v7 }
  0x28   :  { %v127_v18 = vsel %vm95_vm8, %v111_v10, 0  ;;  %v128_v19 = vsel %vm96_vm9, %v112_v11, 0  ;;  %v83_v20 = vand.u32 4095, %v67_v12  ;;  %v84_v21 = vand.u32 4095, %v68_v13 }
  0x29   :  { %v139_v22 = vpack.c.b16 %v128_v19, %v127_v18  ;;  %v129_v23 = vsel %vm97_vm10, %v113_v14, 0  ;;  %v130_v24 = vsel %vm98_vm11, %v114_v15, 0  ;;  %v69_v25 = vadd.s32 12345, %v53_v16 }
  0x2a   :  { %v140_v26 = vpack.c.b16 %v130_v24, %v129_v23  ;;  %v115_v27 = vadd.s32 1, %v83_v20  ;;  %v116_v28 = vadd.s32 1, %v84_v21  ;;  %v70_v29 = vadd.s32 12345, %v54_v17 }
  0x2b   :  { %147 = vst [vmem:[#allocation5 + $0x20] sm:$0xff] %v139_v22  ;;  %v85_v30 = vand.u32 4095, %v69_v25  ;;  %vm101_vm14 = vcmp.gt.s32.totalorder %v37_v6, 0  ;;  %vm102_vm15 = vcmp.gt.s32.totalorder %v38_v7, 0 }
  0x2c   :  { %148 = vst [vmem:[#allocation5 + $0x28] sm:$0xff] %v140_v26  ;;  %v131_v31 = vsel %vm99_vm12, %v115_v27, 0  ;;  %v132_v32 = vsel %vm100_vm13, %v116_v28, 0  ;;  %v86_v33 = vand.u32 4095, %v70_v29 }
  0x2d   :  { %v141_v34 = vpack.c.b16 %v132_v32, %v131_v31  ;;  %v117_v35 = vadd.s32 1, %v85_v30 }
  0x2e   :  { %v118_v36 = vadd.s32 1, %v86_v33 }
  0x2f   :  { %149 = vst [vmem:[#allocation5 + $0x30] sm:$0xff] %v141_v34  ;;  %v133_v37 = vsel %vm101_vm14, %v117_v35, 0 }
  0x30   :  { %v134_v38 = vsel %vm102_vm15, %v118_v36, 0 }
  0x31   :  { %v142_v39 = vpack.c.b16 %v134_v38, %v133_v37 }
  0x33   :  { %150 = vst [vmem:[#allocation5 + $0x38] sm:$0xff] %v142_v39 }
  0x34   :  { %207 = shalt.err (!%p204_p12)
}
  0x35   :  { %s208_s24 = scalar_lea.hbm %s275_s1, 1024 }
  0x36   :  { %p209_p13 = scmp.ne.s32.totalorder %s275_s1, %s208_s24  ;;  %p212_p0 = scmp.lt.u32.totalorder %s208_s24, %s275_s1 }
  0x38   :  { %p214_p1 = pnand %p212_p0, %p209_p13 }
  0x3a   :  { %217 = shalt.err (!%p214_p1)
}
  0x3b   :  { %s226_s29 = smov 512   ;;  %s227_s30 = smov 32  }
  0x3c   :  { %162 = dma.vmem_to_hbm [thread:$0]  %s157_s20, 1024, %s275_s1, [#allocation4], %s226_s29, %s226_s29, %s227_s30  }
  0x3d   :  { %220 = dma.done.wait [#allocation4], 1024  }
  0x3e   :  { %221 = vsyncadd [#allocation4], 4294966272 }
  0x3f   :  { %166 = vsyncpa [#allocation3], 1 }
  0x40   :  { %167 = vsyncpa [#allocation4], 1 }

</bundles_post_ra>
